<compile_context>
chip_gen: v6e
topology: v6e:2x2x1
jax: 0.10.0
libtpu: 0.0.40
codegen_flags: <defaults>
</compile_context>

<pallas_src>
import functools

import numpy as np
import jax
import jax.numpy as jnp
from jax import lax
from jax.experimental import pallas as pl
from jax.experimental.pallas import tpu as pltpu

DILATIONS = (1, 3, 9)
_HALO = sum(DILATIONS)               # residual-chain receptive-field half width (13)
_LANE = 128
_VMEM_LIMIT = 64 * 1024 * 1024       # <= v7x physical VMEM; raises v5e/v6e scoped default
_TILE_BUDGET = 8 << 20               # per-step working-set target (double-buffer headroom)


# ----------------------------- small helpers ----------------------------------

def _weight_norm(v, g):
    """PyTorch weight_norm with dim=0: w = g * v / ||v|| (norm over dims != 0)."""
    norm = jnp.sqrt(jnp.sum(v * v, axis=tuple(range(1, v.ndim)), keepdims=True))
    return g.reshape((-1,) + (1,) * (v.ndim - 1)) * v / norm


def _elu(v, exp_dtype):
    # exp(v)-1 (not expm1) keeps the lowering trivial; fine at 5e-2 tolerance.
    if exp_dtype == jnp.float32:
        neg = jnp.exp(v) - 1.0
    else:
        # v6e/v7x: bf16 EUP runs ~2x f32 transcendental throughput.
        neg = jnp.exp(v.astype(exp_dtype)).astype(jnp.float32) - 1.0
    return jnp.where(v > 0, v, neg)


def _elu_exp_dtype():
    """bf16 exponent on v6e/v7x; keep f32 on v5e and older (no bf16 EUP)."""
    try:
        kind = jax.devices()[0].device_kind.lower()
    except Exception:
        return jnp.float32
    if any(t in kind for t in ("v2", "v3", "v4", "v5")):
        return jnp.float32
    return jnp.bfloat16


@functools.lru_cache(maxsize=None)
def _roll_is_forward():
    """One-time tiny probe: does pltpu.roll match jnp.roll (out[i] = in[i-shift])?"""
    def k(x_ref, o_ref):
        o_ref[...] = pltpu.roll(x_ref[...], 1, axis=1)
    x = jnp.broadcast_to(jnp.arange(128, dtype=jnp.float32), (8, 128))
    y = pl.pallas_call(k, out_shape=jax.ShapeDtypeStruct((8, 128), jnp.float32))(x)
    return bool(np.asarray(y)[0, 1] == 0.0)


def _rot(x, k, use_roll, roll_fwd):
    """jnp.roll semantics along the last axis: out[..., i] = x[..., (i - k) % n]."""
    n = x.shape[-1]
    k = k % n
    if k == 0:
        return x
    if use_roll:
        # XLU rotate -> keeps shifts off the vector load/store slots.
        return pltpu.roll(x, k if roll_fwd else n - k, axis=x.ndim - 1)
    # Fallback for tiny / non-128-aligned time tiles (e.g. unit tests).
    return jnp.concatenate([x[..., n - k:], x[..., :n - k]], axis=-1)


def _pick_time_tile(T, bytes_per_col, budget=_TILE_BUDGET):
    """Largest time tile (multiple of 128 dividing T, or T itself when small) whose
    per-step working set stays within `budget` (keeps the double-buffered footprint
    well under v7x's 64 MiB VMEM; >=512-lane tiles already sit near the HBM roofline)."""
    target = int(budget) // max(int(bytes_per_col), 1)
    target = max(_LANE, (target // _LANE) * _LANE)
    if T <= target:
        return T
    for t in range(target, _LANE - 1, -_LANE):
        if T % t == 0:
            return t
    # TODO(synk): support ragged last tiles instead of falling back to one block.
    return T


# --------------------- kernel A: x+enc, conv_transpose, ELU --------------------

def _make_trans_kernel(TTi, C, s, nA, split, use_roll, roll_fwd, exp_dtype):
    nB = s - nA

    def _store_phases(out_ref, YA, YB):
        for r in range(nA):
            out_ref[0, r] = _elu(YA[r * C:(r + 1) * C, :], exp_dtype).astype(out_ref.dtype)
        for i in range(nB):
            out_ref[0, nA + i] = _elu(YB[i * C:(i + 1) * C, :], exp_dtype).astype(out_ref.dtype)

    if not split:
        # Small-C / v5e path: one bf16 copy of (x+enc) reused inside both depth-4C operands.
        def kernel(x_ref, enc_ref, halo_ref, wA_ref, wB_ref, out_ref):
            xb = x_ref[0] + enc_ref[0]                       # (2C, TTi) bf16, add fused in-kernel
            lh = halo_ref[0, 0][:, 0:1]                      # neighbour col q0-1 (0 at seq start)
            rh = halo_ref[0, 0][:, 1:2]                      # neighbour col q1   (0 at seq end)
            lane = lax.broadcasted_iota(jnp.int32, xb.shape, 1)
            x_prev = jnp.where(lane == 0, lh, _rot(xb, 1, use_roll, roll_fwd))
            x_next = jnp.where(lane == TTi - 1, rh, _rot(xb, -1, use_roll, roll_fwd))
            XA = jnp.concatenate([xb, x_prev], axis=0)        # (4C, TTi) bf16
            XB = jnp.concatenate([x_next, xb], axis=0)        # (4C, TTi) bf16
            YA = jnp.dot(wA_ref[...], XA, preferred_element_type=jnp.float32)
            YB = jnp.dot(wB_ref[...], XB, preferred_element_type=jnp.float32)
            _store_phases(out_ref, YA, YB)
        return kernel

    # Large-C path: only the unshifted xb feeds the MXU; the +/-1 shift is applied to
    # the per-phase results via an XLU roll plus a one-column edge patch.
    def kernel(x_ref, enc_ref, halo_ref, wAc_ref, wAp_ref, wBn_ref, wBc_ref, out_ref):
        xb = x_ref[0] + enc_ref[0]
        lh = halo_ref[0, 0][:, 0:1]
        rh = halo_ref[0, 0][:, 1:2]
        pAc = jnp.dot(wAc_ref[...], xb, preferred_element_type=jnp.float32)   # (nA*C, TTi)
        pAp = jnp.dot(wAp_ref[...], xb, preferred_element_type=jnp.float32)
        pBc = jnp.dot(wBc_ref[...], xb, preferred_element_type=jnp.float32)   # (nB*C, TTi)
        pBn = jnp.dot(wBn_ref[...], xb, preferred_element_type=jnp.float32)
        eA = jnp.dot(wAp_ref[...], lh, preferred_element_type=jnp.float32)    # (nA*C, 1)
        eB = jnp.dot(wBn_ref[...], rh, preferred_element_type=jnp.float32)    # (nB*C, 1)
        laneA = lax.broadcasted_iota(jnp.int32, pAp.shape, 1)
        laneB = lax.broadcasted_iota(jnp.int32, pBn.shape, 1)
        YA = pAc + jnp.where(laneA == 0, eA, _rot(pAp, 1, use_roll, roll_fwd))
        YB = pBc + jnp.where(laneB == TTi - 1, eB, _rot(pBn, -1, use_roll, roll_fwd))
        _store_phases(out_ref, YA, YB)
    return kernel


# --------------------- kernel B: three ResidualUnits ---------------------------

def _make_residual_kernel(TTo, C, hpad, use_roll, roll_fwd, exp_dtype):
    W = TTo + 2 * hpad

    def kernel(y_ref, halo_ref, w1_ref, w3_ref, w9_ref, out_ref, yext_ref):
        t = pl.program_id(1)
        last_t = pl.num_programs(1) - 1

        # Splice [left halo | tile | right halo] into the f32 scratch; with hpad=128
        # the (large) centre store is lane-aligned.
        yext_ref[:, hpad:hpad + TTo] = y_ref[0].astype(jnp.float32)
        yext_ref[:, hpad - _HALO:hpad] = halo_ref[0, 0][:, :_HALO].astype(jnp.float32)
        yext_ref[:, hpad + TTo:hpad + TTo + _HALO] = halo_ref[0, 0][:, _HALO:].astype(jnp.float32)
        if hpad > _HALO:
            pad = hpad - _HALO
            yext_ref[:, :pad] = jnp.zeros((C, pad), jnp.float32)
            yext_ref[:, W - pad:] = jnp.zeros((C, pad), jnp.float32)

        # How many halo columns the *next* unit still consumes (3 after d=1, 9 after d=3).
        fix_after = (3, 9, 0)
        for w_ref, d, fix in zip((w1_ref, w3_ref, w9_ref), DILATIONS, fix_after):
            ycur = yext_ref[...]                              # (C, W) f32 residual base
            yb = ycur.astype(jnp.bfloat16)
            taps = jnp.concatenate(
                [_rot(yb, d, use_roll, roll_fwd), yb, _rot(yb, -d, use_roll, roll_fwd)],
                axis=0)                                       # (3C, W) bf16, keep depth-3C
            h = jnp.dot(w_ref[...], taps, preferred_element_type=jnp.float32)
            yext_ref[...] = ycur + _elu(h, exp_dtype)         # residual accumulation in f32

            if fix:
                # Global sequence edges: the next unit must see reflect padding of the
                # *updated* signal, so re-mirror the halo columns it will read.
                @pl.when(t == 0)
                def _():
                    for m in range(1, fix + 1):
                        yext_ref[:, hpad - m:hpad - m + 1] = yext_ref[:, hpad + m:hpad + m + 1]

                @pl.when(t == last_t)
                def _():
                    e = hpad + TTo - 1
                    for m in range(1, fix + 1):
                        yext_ref[:, e + m:e + m + 1] = yext_ref[:, e - m:e - m + 1]

        out_ref[0] = yext_ref[:, hpad:hpad + TTo].astype(out_ref.dtype)

    return kernel


# ------------------------------- wrapper --------------------------------------

def decblock_forward(x_nct, enc_nct, params, *, stride):
    """x_nct, enc_nct: (B, 2*C, T_in) (PyTorch NCT). Returns (B, C, T_in*stride) f32."""
    B, Cin2, T_in = x_nct.shape
    C = Cin2 // 2
    s = stride
    # TODO(synk): odd strides produce one extra tail sample; only even strides handled.
    assert s >= 2 and s % 2 == 0, "only even strides supported"
    p = s // 2
    K = 2 * s
    T_out = (T_in - 1) * s - 2 * p + K
    assert T_out == T_in * s
    assert T_in >= 2 and T_out > max(DILATIONS), "sequence too short for reflect padding"

    nA = s - p
    f32, bf16 = jnp.float32, jnp.bfloat16
    exp_dtype = _elu_exp_dtype()

    # ---- time-tile choice (grid = (B, n_tiles) for both stages) ----
    TTi = _pick_time_tile(T_in, (40 + 6 * s) * C)    # stage-1 working-set bytes / column
    TTo = _pick_time_tile(T_out, 24 * C)             # stage-2 working-set bytes / column
    nT1, nT2 = T_in // TTi, T_out // TTo
    roll1 = (TTi % _LANE == 0)
    roll2 = (TTo % _LANE == 0)
    roll_fwd = _roll_is_forward() if (roll1 or roll2) else True
    split = roll1 and C >= 128                        # split stage-1 matmuls only for big C
    hpad = _LANE if roll2 else _HALO                  # lane-aligned scratch splice when tiled

    # ---- weight prep (plain-JAX glue): weight-normed weights -> bf16 matmul operands
    Wt = params['w_trans'].astype(f32)                # (2C, C, K)
    if split:
        wAc = jnp.concatenate([Wt[:, :, r + p].T for r in range(nA)], axis=0).astype(bf16)
        wAp = jnp.concatenate([Wt[:, :, r + p + s].T for r in range(nA)], axis=0).astype(bf16)
        wBn = jnp.concatenate([Wt[:, :, r + p - s].T for r in range(nA, s)], axis=0).astype(bf16)
        wBc = jnp.concatenate([Wt[:, :, r + p].T for r in range(nA, s)], axis=0).astype(bf16)
        w_stage1 = (wAc, wAp, wBn, wBc)               # each (n*C, 2C)
    else:
        wA = jnp.concatenate(
            [jnp.concatenate([Wt[:, :, r + p].T, Wt[:, :, r + p + s].T], axis=1)
             for r in range(nA)], axis=0).astype(bf16)            # (nA*C, 4C)
        wB = jnp.concatenate(
            [jnp.concatenate([Wt[:, :, r + p - s].T, Wt[:, :, r + p].T], axis=1)
             for r in range(nA, s)], axis=0).astype(bf16)         # (nB*C, 4C)
        w_stage1 = (wA, wB)

    wres = []
    for d in DILATIONS:
        Wd = params[f'w_dil{d}'].astype(f32)          # (C, C, 3)
        Wp = params[f'w_pw{d}'][:, :, 0].astype(f32)  # (C, C)
        Wcat = jnp.concatenate([Wd[:, :, k] for k in range(3)], axis=1)   # (C, 3C)
        wres.append((Wp @ Wcat).astype(bf16))         # pointwise conv folded into the taps

    # ---- inputs in bf16: halves stage-1 input DMA; the add happens in-kernel
    x_bf = x_nct.astype(bf16)
    enc_bf = enc_nct.astype(bf16)

    # per-tile +/-1 neighbour columns for the conv-transpose (2 cols/tile, zeros at ends)
    ql = jnp.arange(nT1) * TTi - 1
    qr = jnp.arange(nT1) * TTi + TTi

    def _cols(a, idx, valid):
        g = jnp.take(a, jnp.clip(idx, 0, T_in - 1), axis=2)       # (B, 2C, nT1)
        return jnp.where(valid[None, None, :], g, jnp.zeros_like(g))

    lcol = _cols(x_bf, ql, ql >= 0) + _cols(enc_bf, ql, ql >= 0)
    rcol = _cols(x_bf, qr, qr < T_in) + _cols(enc_bf, qr, qr < T_in)
    halo1 = jnp.transpose(jnp.stack([lcol, rcol], axis=-1), (0, 2, 1, 3))   # (B, nT1, 2C, 2)

    def _const_spec(a):
        nd = a.ndim
        return pl.BlockSpec(a.shape, lambda b, t: (0,) * nd)

    cparams = pltpu.CompilerParams(
        dimension_semantics=("parallel", "parallel"),   # shards across v7x's 2 TensorCores
        vmem_limit_bytes=_VMEM_LIMIT)

    # ---- stage 1: conv_transpose as phase matmuls + fused ELU, bf16 phase output
    cost1 = pl.CostEstimate(
        flops=int(2 * B * T_in * (s * C) * (4 * C)),
        transcendentals=int(B * s * C * T_in),
        bytes_accessed=int(2 * (2 * B * Cin2 * T_in + B * s * C * T_in)
                           + 2 * sum(int(w.size) for w in w_stage1)),
    )
    y_ph = pl.pallas_call(
        _make_trans_kernel(TTi, C, s, nA, split, roll1, roll_fwd, exp_dtype),
        out_shape=jax.ShapeDtypeStruct((B, s, C, T_in), bf16),
        grid=(B, nT1),
        in_specs=[
            pl.BlockSpec((1, Cin2, TTi), lambda b, t: (b, 0, t)),
            pl.BlockSpec((1, Cin2, TTi), lambda b, t: (b, 0, t)),
            pl.BlockSpec((1, 1, Cin2, 2), lambda b, t: (b, t, 0, 0)),
        ] + [_const_spec(w) for w in w_stage1],
        out_specs=pl.BlockSpec((1, s, C, TTi), lambda b, t: (b, 0, 0, t)),
        compiler_params=cparams,
        cost_estimate=cost1,
    )(x_bf, enc_bf, halo1, *w_stage1)

    # phase -> time interleave: one cheap bf16 XLA transpose between the two calls.
    # TODO(synk): fold the interleave into stage 1 (strided lane stores / full fusion)
    # to remove this last intermediate HBM roundtrip entirely.
    y = jnp.transpose(y_ph, (0, 2, 3, 1)).reshape(B, C, T_out)

    # per-tile 13-column halos for the residual chain; reflect-mapped at global edges,
    # true neighbour data for interior tiles (tiny gather in glue).
    starts = jnp.arange(nT2) * TTo
    off = jnp.concatenate([jnp.arange(-_HALO, 0), TTo + jnp.arange(_HALO)])
    idx = starts[:, None] + off[None, :]                          # (nT2, 26)
    idx = jnp.where(idx < 0, -idx, idx)
    idx = jnp.where(idx > T_out - 1, 2 * (T_out - 1) - idx, idx)
    idx = jnp.clip(idx, 0, T_out - 1)
    halo2 = jnp.take(y, idx.reshape(-1), axis=2).reshape(B, C, nT2, 2 * _HALO)
    halo2 = jnp.transpose(halo2, (0, 2, 1, 3))                    # (B, nT2, C, 26)

    # ---- stage 2: three ResidualUnits (dilations 1, 3, 9), tiled with halos
    W2 = TTo + 2 * hpad
    cost2 = pl.CostEstimate(
        flops=int(2 * B * nT2 * len(DILATIONS) * C * 3 * C * W2),
        transcendentals=int(B * nT2 * len(DILATIONS) * C * W2),
        bytes_accessed=int(2 * B * C * T_out + 4 * B * C * T_out
                           + 2 * sum(int(w.size) for w in wres)),
    )
    out = pl.pallas_call(
        _make_residual_kernel(TTo, C, hpad, roll2, roll_fwd, exp_dtype),
        out_shape=jax.ShapeDtypeStruct((B, C, T_out), jnp.float32),
        grid=(B, nT2),
        in_specs=[
            pl.BlockSpec((1, C, TTo), lambda b, t: (b, 0, t)),
            pl.BlockSpec((1, 1, C, 2 * _HALO), lambda b, t: (b, t, 0, 0)),
        ] + [_const_spec(w) for w in wres],
        out_specs=pl.BlockSpec((1, C, TTo), lambda b, t: (b, 0, t)),
        scratch_shapes=[pltpu.VMEM((C, W2), jnp.float32)],
        compiler_params=cparams,
        cost_estimate=cost2,
    )(y, halo2, *wres)
    # NOTE: if the stage-2 input DMA is still exposed after tiling, pipeline_mode=
    # pl.Buffered(3) on its BlockSpec is the next cheap knob.
    return out


# -------------------------- deterministic parameters ---------------------------

def init_params(key, C, stride):
    K = 2 * stride
    keys = jax.random.split(key, 14)

    def wn(v_key, g_key, shape):
        v = 0.5 * jax.random.normal(v_key, shape, jnp.float32)
        g = 0.5 + jax.random.uniform(g_key, (shape[0],), jnp.float32)
        return _weight_norm(v, g)

    params = {}
    # ConvTranspose1d weight: (in_channels=2C, out_channels=C, K); weight_norm dim=0
    params['w_trans'] = wn(keys[0], keys[1], (2 * C, C, K))
    i = 2
    for d in DILATIONS:
        params[f'w_dil{d}'] = wn(keys[i], keys[i + 1], (C, C, 3))
        params[f'w_pw{d}'] = wn(keys[i + 2], keys[i + 3], (C, C, 1))
        i += 4
    return params


# --------------------------- numpy reference (checks) --------------------------

def _np_elu(v):
    return np.where(v > 0, v, np.exp(v) - 1.0)


def reference_forward(x, enc, params, stride):
    x = np.asarray(x, np.float64) + np.asarray(enc, np.float64)   # (B, 2C, T_in)
    Wt = np.asarray(params['w_trans'], np.float64)                # (2C, C, K)
    _, C, K = Wt.shape
    B, _, T_in = x.shape
    pad = stride // 2
    T_out = (T_in - 1) * stride - 2 * pad + K

    y = np.zeros((B, C, T_out))
    for b in range(B):
        for j in range(T_in):
            for k in range(K):
                t = j * stride - pad + k
                if 0 <= t < T_out:
                    y[b, :, t] += x[b, :, j] @ Wt[:, :, k]
    y = _np_elu(y)

    for d in DILATIONS:
        Wd = np.asarray(params[f'w_dil{d}'], np.float64)          # (C, C, 3)
        Wp = np.asarray(params[f'w_pw{d}'], np.float64)           # (C, C, 1)
        yp = np.pad(y, ((0, 0), (0, 0), (d, d)), mode='reflect')
        h = np.zeros_like(y)
        for k in range(3):
            h += np.einsum('oi,bit->bot', Wd[:, :, k], yp[:, :, k * d:k * d + T_out])
        h = np.einsum('oi,bit->bot', Wp[:, :, 0], h)
        y = y + _np_elu(h)
    return y


# ------------------------------------ main -------------------------------------

if __name__ == "__main__":
    B, C, stride, T_in = 2, 4, 2, 8     # x: (B, 2*C, T_in) -> out: (B, C, T_in*stride)

    key = jax.random.PRNGKey(0)
    kx, ke, kp = jax.random.split(key, 3)
    x = jax.random.normal(kx, (B, 2 * C, T_in), jnp.float32)
    enc = jax.random.normal(ke, (B, 2 * C, T_in), jnp.float32)
    params = init_params(kp, C, stride)

    out = decblock_forward(x, enc, params, stride=stride)
    out = jax.block_until_ready(out)

    ref = reference_forward(np.asarray(x), np.asarray(enc),
                            {k2: np.asarray(v) for k2, v in params.items()}, stride)
    np.testing.assert_allclose(np.asarray(out), ref, rtol=5e-2, atol=5e-2)

    print("KERNEL_OK")
</pallas_src>

<mosaic_0001>
module attributes {stable_mosaic.version = 11 : i64} {
  func.func @kernel(%arg0: i32, %arg1: i32, %arg2: memref<1x8x8xbf16, #tpu.memory_space<vmem>>, %arg3: memref<1x8x8xbf16, #tpu.memory_space<vmem>>, %arg4: memref<1x1x8x2xbf16, #tpu.memory_space<vmem>>, %arg5: memref<4x16xbf16, #tpu.memory_space<vmem>>, %arg6: memref<4x16xbf16, #tpu.memory_space<vmem>>, %arg7: memref<1x2x4x8xbf16, #tpu.memory_space<vmem>>) attributes {dimension_semantics = [#tpu.dimension_semantics<parallel>, #tpu.dimension_semantics<parallel>], iteration_bounds = array<i64: 2, 1>, scalar_prefetch = 0 : i64, scratch_operands = 0 : i64, tpu.core_type = #tpu.core_type<tc>, window_params = [{transform_indices = @transform_0, window_bounds = array<i64: 1, 8, 8>}, {transform_indices = @transform_1, window_bounds = array<i64: 1, 8, 8>}, {transform_indices = @transform_2, window_bounds = array<i64: 1, 1, 8, 2>}, {pipeline_mode = #tpu.pipeline_mode<synchronous>, transform_indices = @transform_3, window_bounds = array<i64: 4, 16>}, {pipeline_mode = #tpu.pipeline_mode<synchronous>, transform_indices = @transform_4, window_bounds = array<i64: 4, 16>}, {transform_indices = @transform_5, window_bounds = array<i64: 1, 2, 4, 8>}]} {
    %c0 = arith.constant 0 : index
    %c0_0 = arith.constant 0 : index
    %c0_1 = arith.constant 0 : index
    %0 = vector.load %arg2[%c0, %c0_0, %c0_1] : memref<1x8x8xbf16, #tpu.memory_space<vmem>>, vector<1x8x8xbf16>
    %1 = vector.shape_cast %0 : vector<1x8x8xbf16> to vector<8x8xbf16>
    %c0_2 = arith.constant 0 : index
    %c0_3 = arith.constant 0 : index
    %c0_4 = arith.constant 0 : index
    %2 = vector.load %arg3[%c0_2, %c0_3, %c0_4] : memref<1x8x8xbf16, #tpu.memory_space<vmem>>, vector<1x8x8xbf16>
    %3 = vector.shape_cast %2 : vector<1x8x8xbf16> to vector<8x8xbf16>
    %4 = arith.addf %1, %3 : vector<8x8xbf16>
    %c0_5 = arith.constant 0 : index
    %c0_6 = arith.constant 0 : index
    %c0_7 = arith.constant 0 : index
    %c0_8 = arith.constant 0 : index
    %5 = vector.load %arg4[%c0_5, %c0_6, %c0_7, %c0_8] : memref<1x1x8x2xbf16, #tpu.memory_space<vmem>>, vector<1x1x8x2xbf16>
    %6 = vector.shape_cast %5 : vector<1x1x8x2xbf16> to vector<8x2xbf16>
    %7 = vector.extract_strided_slice %6 {offsets = [0, 0], sizes = [8, 1], strides = [1, 1]} : vector<8x2xbf16> to vector<8x1xbf16>
    %c0_9 = arith.constant 0 : index
    %c0_10 = arith.constant 0 : index
    %c0_11 = arith.constant 0 : index
    %c0_12 = arith.constant 0 : index
    %8 = vector.load %arg4[%c0_9, %c0_10, %c0_11, %c0_12] : memref<1x1x8x2xbf16, #tpu.memory_space<vmem>>, vector<1x1x8x2xbf16>
    %9 = vector.shape_cast %8 : vector<1x1x8x2xbf16> to vector<8x2xbf16>
    %10 = vector.extract_strided_slice %9 {offsets = [0, 1], sizes = [8, 1], strides = [1, 1]} : vector<8x2xbf16> to vector<8x1xbf16>
    %11 = tpu.iota {dimensions = array<i32: 1>} : vector<8x8xi32>
    %c0_i32 = arith.constant 0 : i32
    %12 = vector.broadcast %c0_i32 : i32 to vector<8x8xi32>
    %13 = arith.cmpi eq, %11, %12 : vector<8x8xi32>
    %14 = vector.extract_strided_slice %4 {offsets = [0, 7], sizes = [8, 1], strides = [1, 1]} : vector<8x8xbf16> to vector<8x1xbf16>
    %15 = vector.extract_strided_slice %4 {offsets = [0, 0], sizes = [8, 7], strides = [1, 1]} : vector<8x8xbf16> to vector<8x7xbf16>
    %16 = tpu.concatenate %14, %15 in 1 : vector<8x1xbf16>, vector<8x7xbf16> -> vector<8x8xbf16>
    %17 = vector.shape_cast %7 : vector<8x1xbf16> to vector<8x1xbf16>
    %18 = vector.broadcast %17 : vector<8x1xbf16> to vector<8x8xbf16>
    %19 = arith.select %13, %18, %16 : vector<8x8xi1>, vector<8x8xbf16>
    %c7_i32 = arith.constant 7 : i32
    %20 = vector.broadcast %c7_i32 : i32 to vector<8x8xi32>
    %21 = arith.cmpi eq, %11, %20 : vector<8x8xi32>
    %22 = vector.extract_strided_slice %4 {offsets = [0, 1], sizes = [8, 7], strides = [1, 1]} : vector<8x8xbf16> to vector<8x7xbf16>
    %23 = vector.extract_strided_slice %4 {offsets = [0, 0], sizes = [8, 1], strides = [1, 1]} : vector<8x8xbf16> to vector<8x1xbf16>
    %24 = tpu.concatenate %22, %23 in 1 : vector<8x7xbf16>, vector<8x1xbf16> -> vector<8x8xbf16>
    %25 = vector.shape_cast %10 : vector<8x1xbf16> to vector<8x1xbf16>
    %26 = vector.broadcast %25 : vector<8x1xbf16> to vector<8x8xbf16>
    %27 = arith.select %21, %26, %24 : vector<8x8xi1>, vector<8x8xbf16>
    %28 = tpu.concatenate %4, %19 in 0 : vector<8x8xbf16>, vector<8x8xbf16> -> vector<16x8xbf16>
    %29 = tpu.concatenate %27, %4 in 0 : vector<8x8xbf16>, vector<8x8xbf16> -> vector<16x8xbf16>
    %c0_13 = arith.constant 0 : index
    %c0_14 = arith.constant 0 : index
    %30 = vector.load %arg5[%c0_13, %c0_14] : memref<4x16xbf16, #tpu.memory_space<vmem>>, vector<4x16xbf16>
    %cst = arith.constant dense<0.000000e+00> : vector<4x8xf32>
    %31 = tpu.matmul %30, %28, %cst {dimension_numbers = #tpu.dot_dimension_numbers<[1], [0], [0], [1], [0, 0, 1, 1], [], []>} : vector<4x16xbf16>, vector<16x8xbf16>, vector<4x8xf32> -> vector<4x8xf32>
    %c0_15 = arith.constant 0 : index
    %c0_16 = arith.constant 0 : index
    %32 = vector.load %arg6[%c0_15, %c0_16] : memref<4x16xbf16, #tpu.memory_space<vmem>>, vector<4x16xbf16>
    %cst_17 = arith.constant dense<0.000000e+00> : vector<4x8xf32>
    %33 = tpu.matmul %32, %29, %cst_17 {dimension_numbers = #tpu.dot_dimension_numbers<[1], [0], [0], [1], [0, 0, 1, 1], [], []>} : vector<4x16xbf16>, vector<16x8xbf16>, vector<4x8xf32> -> vector<4x8xf32>
    %34 = arith.truncf %31 : vector<4x8xf32> to vector<4x8xbf16>
    %35 = math.exp %34 : vector<4x8xbf16>
    %36 = arith.extf %35 : vector<4x8xbf16> to vector<4x8xf32>
    %cst_18 = arith.constant 1.000000e+00 : f32
    %37 = vector.broadcast %cst_18 : f32 to vector<4x8xf32>
    %38 = arith.subf %36, %37 : vector<4x8xf32>
    %cst_19 = arith.constant 0.000000e+00 : f32
    %39 = vector.broadcast %cst_19 : f32 to vector<4x8xf32>
    %40 = arith.cmpf ogt, %31, %39 : vector<4x8xf32>
    %41 = arith.select %40, %31, %38 : vector<4x8xi1>, vector<4x8xf32>
    %42 = arith.truncf %41 : vector<4x8xf32> to vector<4x8xbf16>
    %c0_20 = arith.constant 0 : index
    %c0_21 = arith.constant 0 : index
    %c0_22 = arith.constant 0 : index
    %c0_23 = arith.constant 0 : index
    %43 = vector.load %arg7[%c0_20, %c0_21, %c0_22, %c0_23] : memref<1x2x4x8xbf16, #tpu.memory_space<vmem>>, vector<1x1x4x8xbf16>
    %44 = vector.shape_cast %43 : vector<1x1x4x8xbf16> to vector<4x8xbf16>
    %45 = vector.shape_cast %42 : vector<4x8xbf16> to vector<1x1x4x8xbf16>
    tpu.vector_store %arg7[%c0_20, %c0_21, %c0_22, %c0_23], %45 {strides = array<i32>} : memref<1x2x4x8xbf16, #tpu.memory_space<vmem>>, vector<1x1x4x8xbf16>,
    %46 = arith.truncf %33 : vector<4x8xf32> to vector<4x8xbf16>
    %47 = math.exp %46 : vector<4x8xbf16>
    %48 = arith.extf %47 : vector<4x8xbf16> to vector<4x8xf32>
    %cst_24 = arith.constant 1.000000e+00 : f32
    %49 = vector.broadcast %cst_24 : f32 to vector<4x8xf32>
    %50 = arith.subf %48, %49 : vector<4x8xf32>
    %cst_25 = arith.constant 0.000000e+00 : f32
    %51 = vector.broadcast %cst_25 : f32 to vector<4x8xf32>
    %52 = arith.cmpf ogt, %33, %51 : vector<4x8xf32>
    %53 = arith.select %52, %33, %50 : vector<4x8xi1>, vector<4x8xf32>
    %54 = arith.truncf %53 : vector<4x8xf32> to vector<4x8xbf16>
    %c0_26 = arith.constant 0 : index
    %c1 = arith.constant 1 : index
    %c0_27 = arith.constant 0 : index
    %c0_28 = arith.constant 0 : index
    %55 = vector.load %arg7[%c0_26, %c1, %c0_27, %c0_28] : memref<1x2x4x8xbf16, #tpu.memory_space<vmem>>, vector<1x1x4x8xbf16>
    %56 = vector.shape_cast %55 : vector<1x1x4x8xbf16> to vector<4x8xbf16>
    %57 = vector.shape_cast %54 : vector<4x8xbf16> to vector<1x1x4x8xbf16>
    tpu.vector_store %arg7[%c0_26, %c1, %c0_27, %c0_28], %57 {strides = array<i32>} : memref<1x2x4x8xbf16, #tpu.memory_space<vmem>>, vector<1x1x4x8xbf16>,
    return
  }
  func.func @transform_0(%arg0: i32, %arg1: i32) -> (i32, i32, i32) {
    %c0_i32 = arith.constant 0 : i32
    %c0_i32_0 = arith.constant 0 : i32
    return %arg0, %c0_i32, %arg1 : i32, i32, i32
  }
  func.func @transform_1(%arg0: i32, %arg1: i32) -> (i32, i32, i32) {
    %c0_i32 = arith.constant 0 : i32
    %c0_i32_0 = arith.constant 0 : i32
    return %arg0, %c0_i32, %arg1 : i32, i32, i32
  }
  func.func @transform_2(%arg0: i32, %arg1: i32) -> (i32, i32, i32, i32) {
    %c0_i32 = arith.constant 0 : i32
    %c0_i32_0 = arith.constant 0 : i32
    %c0_i32_1 = arith.constant 0 : i32
    return %arg0, %arg1, %c0_i32, %c0_i32_0 : i32, i32, i32, i32
  }
  func.func @transform_3(%arg0: i32, %arg1: i32) -> (i32, i32) {
    %c0_i32 = arith.constant 0 : i32
    %c0_i32_0 = arith.constant 0 : i32
    %c0_i32_1 = arith.constant 0 : i32
    return %c0_i32, %c0_i32_0 : i32, i32
  }
  func.func @transform_4(%arg0: i32, %arg1: i32) -> (i32, i32) {
    %c0_i32 = arith.constant 0 : i32
    %c0_i32_0 = arith.constant 0 : i32
    %c0_i32_1 = arith.constant 0 : i32
    return %c0_i32, %c0_i32_0 : i32, i32
  }
  func.func @transform_5(%arg0: i32, %arg1: i32) -> (i32, i32, i32, i32) {
    %c0_i32 = arith.constant 0 : i32
    %c0_i32_0 = arith.constant 0 : i32
    %c0_i32_1 = arith.constant 0 : i32
    return %arg0, %c0_i32, %c0_i32_0, %arg1 : i32, i32, i32, i32
  }
}

</mosaic_0001>

<bundles_post_ra>
// kernel: tpu_custom_call.1
= control target key start
LH: loop header
LB: loop body
LE: loop exit
PB: predicated region body
PF: predicated region fallthrough
CT: control target
= control target key end

     0   :  { %10 = vsyncpa [#allocation3], 0  ;;  %s1062_s0 = inlined_call_operand.vmem [shape: bf16[2,8,8], index: 0, kind: input, shape index: {}]   ;;  %s1063_s1 = inlined_call_operand.hbm [shape: bf16[2,8,8], index: 1, kind: input, shape index: {}]   ;;  %s1064_s2 = inlined_call_operand.vmem [shape: bf16[2,1,8,2], index: 2, kind: input, shape index: {}]   ;;  %s1065_s3 = inlined_call_operand.vmem [shape: bf16[4,16], index: 3, kind: input, shape index: {}]   ;;  %s1066_s4 = inlined_call_operand.vmem [shape: bf16[4,16], index: 4, kind: input, shape index: {}]   ;;  %s1067_s5 = inlined_call_operand.hbm [shape: bf16[2,2,4,8], index: 5, kind: output, shape index: {}]  }
   0x1   :  { %12 = vsyncpa [#allocation3 + $0x1], 0 }
   0x2   :  { %13 = vsyncpa [#allocation4], 0 }
   0x3   :  { %15 = vsyncpa [#allocation4 + $0x1], 0  ;;  %s894_s18 = smov 0   ;;  %s896_s19 = smov 0  }
   0x4   :  { %s898_s20 = smov 0   ;;  %s900_s21 = smov 0  }
   0x5   :  { %s902_s22 = smov 0   ;;  %s904_s23 = smov 0  }
   0x6 LB: > { %s622_s24 = sadd.s32 4294967295, %s849_s23   ;;  %s623_s25 = sadd.s32 4294967294, %s849_s23   ;;  %s849_s23 = sphi %s904_s23, %s21_s23   ;;  %s845_s22 = sphi %s902_s22, %s1079_s22   ;;  %s841_s21 = sphi %s900_s21, %s1078_s21   ;;  %s837_s20 = sphi %s898_s20, %s1077_s20   ;;  %s833_s19 = sphi %s896_s19, %s1076_s19   ;;  %s829_s18 = sphi %s894_s18, %s1075_s18  }
   0x7   : > { %s33_s26 = sadd.s32 1, %s845_s22  ;;  %s70_s27 = sadd.s32 1, %s837_s20 }
   0x8   : > { %p35_p0 = scmp.ge.s32.totalorder %s33_s26, 2  ;;  %p77_p1 = scmp.ne.s32.totalorder %s837_s20, %s833_s19 }
   0x9   : > { %p78_p2 = scmp.eq.s32.totalorder %s849_s23, 0  ;;  %p83_p3 = scmp.ne.s32.totalorder %s833_s19, %s829_s18 }
   0xa   : > { %s1081_s26 = smov (%p35_p0, %s33_s26), 0  ;;  %p84_p5 = scmp.eq.s32.totalorder %s622_s24, 0 }
   0xb   : > { %p935_p4 = por %p78_p2, %p77_p1  ;;  %s65_s29 = ssub.s32 %s845_s22, %s1081_s26 }
   0xc   : > { %p179_p6 = scmp.eq.s32.totalorder %s622_s24, 1  ;;  %p68_p7 = scmp.eq.s32.totalorder %s65_s29, 0 }
   0xd   : > { %p941_p8 = por %p84_p5, %p83_p3  ;;  %p185_p10 = scmp.eq.s32.totalorder %s623_s25, 1 }
   0xe   : > { %p945_p9 = por %p179_p6, %p77_p1  ;;  %p674_p13 = scmp.lt.s32.totalorder %s849_s23, 2 }
   0xf   : > { %s950_s7 = scalar_select %p68_p7, %s837_s20, %s70_s27  }
  0x10   : > { %p952_p11 = por %p185_p10, %p83_p3  ;;  %s221_s9 = sand.u32 1, %s837_s20  }
  0x11   : > { %s626_s10 = sshll.u32 %s221_s9, 2  ;;  %s627_s11 = sshll.u32 %s845_s22, 6 }
  0x12   : > { %s1071_s8 = scalar_select %p952_p11, 1, 0 }
  0x13   : > { %s231_s14 = scalar_lea.hbm %s1063_s1, %s627_s11  ;;  %s225_s15 = scalar_lea.vmem [#allocation2], %s626_s10 }
  0x14   : > { %s233_s16 = sshll.u32 %s225_s15, 4  ;;  %p965_p0 = pnand %p674_p13, %p935_p4  ;;  %s234_s16 = int_to_ptr.vmem [resolvable:$true] %s233_s16 }
  0x15   : > { %p628_p1 = scmp.ge.s32.totalorder %s849_s23, 1  ;;  %p248_p2 = scmp.lt.s32.totalorder %s849_s23, 3 }
  0x16   : > { %s222_s24 = scalar_lea.sflag [#allocation3], %s221_s9  ;;  %p743_p3 = pneg %p965_p0 }
  0x17   : > { %s754_s25 = scalar_lea.vmem %s234_s16, 64  ;;  %s851_s27 = smov [#allocation2]  }
  0x18   : > { %p755_p5 = scmp.ne.s32.totalorder %s234_s16, %s754_s25  ;;  %s759_s29 = sshll.u32 %s851_s27, 4  ;;  %s760_s29 = int_to_ptr.vmem [resolvable:$false] %s759_s29 }
  0x19   : > { %s761_s10 = scalar_lea.vmem %s760_s29, 128  ;;  %p762_p10 = scmp.lt.s32.totalorder %s234_s16, %s760_s29 }
  0x1a   : > { %p757_p6 = pnand %p755_p5, %p743_p3  ;;  %p763_p12 = scmp.lt.s32.totalorder %s761_s10, %s754_s25 }
  0x1c   : > { %p758_p7 = pneg %p757_p6  ;;  %p764_p4 = por %p763_p12, %p762_p10 }
  0x1e   : > { %p765_p13 = pnand %p764_p4, %p758_p7 }
  0x20   : > { %768 = shalt.err (!%p765_p13)
}
  0x21   : > { %669 = dma.hbm_to_vmem [thread:$0]  (!%p965_p0), %s231_s14, 64, %s234_s16, %s222_s24  }
  0x22   : > { %p249_p11 = pnand %p628_p1, %p248_p2 }
  0x23   : > { %s980_s28 = sand.u32 (!%p249_p11), 1, %s833_s19  }
  0x24   : > { %252 = sbr.rel (%p249_p11) target bundleno = 421 (0x1a5), region = 40  ;;  %s629_s9 = sshll.u32 (!%p249_p11), %s980_s28, 2 }
  0x25   : > { %s255_s11 = scalar_lea.sflag (!%p249_p11), [#allocation3], %s980_s28  ;;  %s258_s12 = scalar_lea.vmem (!%p249_p11), [#allocation2], %s629_s9 }
  0x29   : > { %820 = dma.done.wait (%p941_p8), %s255_s11, 64  }
  0x2a   : > { %822 = vsyncadd (%p941_p8), %s255_s11, 4294967232  ;;  %p299_p12 = scmp.lt.s32.totalorder %s841_s21, 1  ;;  %v852_v0 = vmov 0   ;;  %v315_v3 = vld [vmem:[%s258_s12] sm:$0xf]  ;;  %v853_v5 = vmov 0.0   ;;  %v318_v8 = vlaneseq }
  0x2b   : > { %735 = vset.pattern.permute.xlu0 %v852_v0  ;;  %650 = vmatprep.subr.bf16.mxu0 %v853_v5  ;;  %vm854_vm0 = vmmov 0   ;;  %v855_v7 = vmov 1   ;;  %s856_s30 = smov 121   ;;  %s857_s29 = smov 1   ;;  %v860_v9 = vmov 839922192  }
  0x2c   : > { %s300_s13 = scalar_select %p299_p12, %s841_s21, 1  ;;  %656 = vmatprep.subr.bf16.mxu1 %v853_v5  ;;  %652 = vmatprep.mubr.msk.bf16.mxu0 %vm854_vm0, %v853_v5  ;;  %v339_v10 = vunpack.c.l.s4 %v860_v9  ;;  %v342_v12 = vshrl.u32 %v318_v8, 7  ;;  %v319_v13 = vand.u32 127, %v318_v8  ;;  %vm328_vm2 = vcmask 7168   ;;  %v382_v25 = vld [vmem:[%s1065_s3] sm:$0x3] }
  0x2d   : > { %658 = vmatprep.mubr.msk.bf16.mxu1 %vm854_vm0, %v853_v5  ;;  %s858_s10 = smov 7   ;;  %s859_s11 = smov 127   ;;  %vm373_vm4 = vcmask 1043456   ;;  %vm352_vm6 = vcmask 56320   ;;  %vm383_vm7 = vcmask 130048   ;;  %vm480_vm10 = vcmask 58368  }
  0x2e   : > { %s631_s14 = sshll.u32 %s300_s13, 2  ;;  %v340_v11 = vunpack.c.0.s8 %v339_v10  ;;  %vm320_vm1 = vcmp.eq.s32.totalorder %v319_v13, 0  ;;  %vm347_vm5 = vcmp.eq.s32.totalorder %v319_v13, 7  ;;  %v427_v31 = vld [vmem:[%s1066_s4] sm:$0x3]  ;;  %s298_s16 = scalar_lea.vmem [#allocation5], %s629_s9 }
  0x2f   : > { %s305_s17 = scalar_lea.vmem %s1062_s0, %s631_s14  ;;  %s312_s27 = scalar_lea.vmem %s1064_s2, %s631_s14  ;;  %vm345_vm3 = vmpackc.low %vm320_vm1, %vm320_vm1 }
  0x30   : > { %v317_v1 = vld [vmem:[%s312_s27] sm:$0xf]  ;;  %v343_v15 = vsub.s32 %v340_v11, %v342_v12  ;;  %vm368_vm8 = vmpackc.low %vm347_vm5, %vm347_vm5  ;;  %s508_s24 = sshll.u32 %s298_s16, 4  ;;  %s1014_s24 = int_to_ptr.vmem [resolvable:$true] %s508_s24 }
  0x31   : > { %v314_v2 = vld [vmem:[%s305_s17] sm:$0xf]  ;;  %335 = vperm.xlu0 %735, %v317_v1   ;;  %s645_s17 = sshll.u32 %s841_s21, 6  ;;  %s769_s9 = scalar_lea.vmem %s1014_s24, 64 }
  0x32   : > { %v316_v4 = vadd.bf16 %v315_v3, %v314_v2  ;;  %p770_p8 = scmp.ne.s32.totalorder %s1014_s24, %s769_s9  ;;  %s861_s21 = smov [#allocation5]  }
  0x34   : > { %v633_v6 = vcombine.low %v316_v4, %v316_v4  ;;  %p771_p11 = pnand %p770_p8, %p945_p9 }
  0x35   : > { %736 = vset.pattern.permute.xlu0 %v855_v7 }
  0x36   : > { %324 = vrot.lane.b32.xlu1 %v633_v6, %s856_s30  ;;  %358 = vperm.xlu0 %736, %v317_v1   ;;  %s1012_s30 = scalar_lea.hbm %s1067_s5, %s645_s17  ;;  %p772_p0 = pneg %p771_p11 }
  0x3a   : > { %326 = vrot.lane.b32.xlu1 %v633_v6, %s857_s29  ;;  %350 = vrot.lane.b32.xlu0 %v633_v6, %s858_s10  ;;  %s494_s29 = scalar_lea.sflag [#allocation4], %s980_s28  ;;  %s773_s10 = sshll.u32 %s861_s21, 4  ;;  %s774_s10 = int_to_ptr.vmem [resolvable:$false] %s773_s10 }
  0x3b   : > { %p776_p1 = scmp.lt.s32.totalorder %s1014_s24, %s774_s10 }
  0x3e   : > { %348 = vrot.lane.b32.xlu1 %v633_v6, %s859_s11  ;;  %s775_s11 = scalar_lea.vmem %s774_s10, 128 }
  0x3f   : > { %p777_p2 = scmp.lt.s32.totalorder %s775_s11, %s769_s9 }
  0x41   : > { %p778_p3 = por %p777_p2, %p776_p1 }
  0x43   : > { %p779_p5 = pnand %p778_p3, %p772_p0 }
  0xa8   : > { %v325_v14 = vpop.permute.xlu1 %324 }
  0xac   : > { %v327_v16 = vpop.permute.xlu1 %326  ;;  %v336_v17 = vpop.permute.xlu0 %335 }
  0xad   : > { %v331_v18 = vsel %vm328_vm2, %v325_v14, %v327_v16  ;;  %v344_v19 = vrot.slane %v336_v17, %v343_v15 }
  0xaf   : > { %v346_v20 = vsel %vm345_vm3, %v344_v19, %v331_v18 }
  0xb0   : > { %v634_v21 = vcombine.low %v346_v20, %v346_v20  ;;  %v349_v24 = vpop.permute.xlu1 %348 }
  0xb1   : > { %v359_v22 = vpop.permute.xlu0 %358 }
  0xb2   : > { %v376_v23 = vsel %vm373_vm4, %v316_v4, %v634_v21  ;;  %v367_v26 = vrot.slane %v359_v22, %v343_v15 }
  0xb3   : > { %651 = vmatpush3.bf16.msra.mxu0 %v376_v23 }
  0xb5   : > { %v351_v27 = vpop.permute.xlu0 %350 }
  0xb6   : > { %v355_v28 = vsel %vm352_vm6, %v349_v24, %v351_v27  ;;  %653 = vmatmul.mubr.msk.bf16.vlgmr.msra.gmra.mxu0 %vm383_vm7, %v382_v25 }
  0xb7   : > { %v369_v29 = vsel %vm368_vm8, %v367_v26, %v355_v28 }
  0xb8   : > { %v380_v30 = vsel %vm373_vm4, %v369_v29, %v633_v6 }
  0xb9   : > { %657 = vmatpush3.bf16.msra.mxu1 %v380_v30 }
  0xbc   : > { %659 = vmatmul.mubr.msk.bf16.vlgmr.msra.gmra.mxu1 %vm383_vm7, %v427_v31 }
 0x176   : > { %v421_v32 = vpop.f32.mrf.mxu0 }
 0x177   : > { %v471_v33 = vpack.c.bf16 %v421_v32, %v421_v32  ;;  %vm477_vm9 = vcmp.gt.f32.partialorder %v421_v32, 0.0 }
 0x178   : > { %v654_v34 = vpop.f32.mrf.mxu0 }
 0x179   : > { %v473_v35 = vmul.bf16 1069105081, %v471_v33 }
 0x17a   : > { %v424_v36 = vpop.f32.mrf.mxu0 }
 0x17b   : > { %737 = vpow.bf16 %v473_v35 }
 0x17c   : > { %v655_v37 = vpop.f32.mrf.mxu0  ;;  %v465_v38 = vpop.f32.mrf.mxu1 }
 0x17d   : > { %v482_v39 = vpack.c.bf16 %v465_v38, %v465_v38  ;;  %vm488_vm11 = vcmp.gt.f32.partialorder %v465_v38, 0.0 }
 0x17e   : > { %v660_v40 = vpop.f32.mrf.mxu1 }
 0x17f   : > { %v484_v41 = vmul.bf16 1069105081, %v482_v39 }
 0x180   : > { %v468_v42 = vpop.f32.mrf.mxu1 }
 0x181   : > { %739 = vpow.bf16 %v484_v41 }
 0x182   : > { %v661_v43 = vpop.f32.mrf.mxu1 }
 0x189   : > { %v738_v44 = vpop.eup %737 }
 0x18a   : > { %v475_v45 = vunpack.c.l.bf16 %v738_v44 }
 0x18c   : > { %v637_v46 = vadd.f32 -1.0, %v475_v45 }
 0x18e   : > { %v478_v47 = vsel %vm477_vm9, %v421_v32, %v637_v46 }
 0x18f   : > { %v740_v48 = vpop.eup %739  ;;  %v479_v49 = vpack.c.bf16 %v478_v47, %v478_v47 }
 0x190   : > { %v486_v50 = vunpack.c.l.bf16 %v740_v48 }
 0x191   : > { %481 = vst.msk [vmem:[%s298_s16] sm:$0x3] %vm480_vm10, %v479_v49 }
 0x192   : > { %v638_v51 = vadd.f32 -1.0, %v486_v50 }
 0x194   : > { %v489_v52 = vsel %vm488_vm11, %v465_v38, %v638_v51 }
 0x195   : > { %v490_v53 = vpack.c.bf16 %v489_v52, %v489_v52 }
 0x197   : > { %639 = vst.msk [vmem:[%s298_s16 + $0x2] sm:$0x3] %vm480_vm10, %v490_v53 }
 0x198   : > { %782 = shalt.err (!%p779_p5)
}
 0x199   : > { %s783_s12 = scalar_lea.hbm %s1012_s30, 64  ;;  %s787_s15 = scalar_lea.hbm %s1067_s5, 128 }
 0x19a   : > { %p784_p6 = scmp.ne.s32.totalorder %s1012_s30, %s783_s12  ;;  %p788_p4 = scmp.lt.s32.totalorder %s1012_s30, %s1067_s5 }
 0x19b   : > { %p789_p13 = scmp.lt.s32.totalorder %s787_s15, %s783_s12 }
 0x19c   : > { %p785_p7 = pnand %p784_p6, %p945_p9 }
 0x19d   : > { %p790_p12 = por %p789_p13, %p788_p4 }
 0x19e   : > { %p786_p10 = pneg %p785_p7 }
 0x1a0   : > { %p791_p8 = pnand %p790_p12, %p786_p10 }
 0x1a2   : > { %794 = shalt.err (!%p791_p8)
}
 0x1a3   : > { %s862_s25 = smov 32   ;;  %s863_s27 = smov 2  }
 0x1a4   : > { %664 = dma.vmem_to_hbm [thread:$0]  (%p945_p9), %s1014_s24, 64, %s1012_s30, %s494_s29, %s862_s25, %s862_s25, %s863_s27  }
 0x1a5 PF: > { %s523_s9 = sand.u32 1, %s829_s18   ;;  %p1073_p11 = scmp.ne.s32.totalorder %s1071_s8, 0 }
 0x1a6   : > { %p1074_p0 = scmp.ge.s32.totalorder %s849_s23, 2  ;;  %s524_s21 = scalar_lea.sflag [#allocation4], %s523_s9 }
 0x1a8   : > { %p671_p1 = pnand %p1074_p0, %p1073_p11 }
 0x1aa   : > { %p672_p2 = pneg %p671_p1 }
 0x1ac   : > { %824 = dma.done.wait (%p672_p2), %s524_s21, 64  }
 0x1ad   : > { %826 = vsyncadd (%p672_p2), %s524_s21, 4294967232  ;;  %s21_s23 = sadd.s32 1, %s849_s23   ;;  %s1075_s18 = smov %s833_s19 }
 0x1ae   : > { %p18_p3 = scmp.ge.s32.totalorder %s21_s23, 4   ;;  %s1076_s19 = smov %s837_s20 }
 0x1af   : > { %s1077_s20 = smov %s950_s7  ;;  %s1078_s21 = smov %s845_s22 }
 0x1b0   : > { %s1079_s22 = smov %s1081_s26  ;;  %20 = sbr.rel (!%p18_p3) target bundleno = 6 (0x6), region = 92 }
 0x1b5   :  { %529 = vsyncpa [#allocation3], 1 }
 0x1b6   :  { %531 = vsyncpa [#allocation3 + $0x1], 1 }
 0x1b7   :  { %532 = vsyncpa [#allocation4], 1 }
 0x1b8   :  { %534 = vsyncpa [#allocation4 + $0x1], 1 }

</bundles_post_ra>
